<compile_context>
chip_gen: v5e
topology: v5e:2x2
jax: 0.10.0
libtpu: 0.0.40
codegen_flags: <defaults>
</compile_context>

<pallas_src>
import math

import numpy as np
import jax
import jax.numpy as jnp
from jax.experimental import pallas as pl
from jax.experimental.pallas import tpu as pltpu


def build_emb_table(num_emb: int, d_model: int) -> jnp.ndarray:
    """Deterministic reproduction of the PyTorch __init__ table (including its
    unconventional use of `pos` over d_model and `i` over num_emb//2)."""
    emb = np.zeros((num_emb, d_model), dtype=np.float32)
    for i in range(num_emb // 2):
        for pos in range(d_model):
            emb[2 * i, pos] = math.sin(pos / 10000 ** (2 * i / d_model))
    for j in range(0, num_emb, 2):
        i = j // 2
        for pos in range(d_model):
            emb[2 * i + 1, pos] = math.cos(pos / 10000 ** (2 * i / d_model))
    return jnp.asarray(emb)


def _pe_broadcast_kernel(emb_ref, out_ref):
    # emb_ref: VMEM (st, d_model)        -- one seq tile of the table
    # out_ref: VMEM (bt, st, d_model)    -- bt batch rows of that seq tile
    # Dense full-vreg tile copies: the (st, d_model) layout is preserved across
    # the leading batch dim, so no sublane replication is needed.
    out_ref[...] = jnp.broadcast_to(emb_ref[...][None, :, :], out_ref.shape)


def _choose_seq_tile(seq_len: int, row_bytes: int, budget_bytes: int) -> int:
    """Seq tile: multiple of 8 sublanes (or the full seq_len), ~budget_bytes of
    f32 per input block, preferring an exact divisor of seq_len."""
    align = 8
    if seq_len <= align:
        return seq_len
    target = max(align, budget_bytes // max(row_bytes, 1))
    cap = min(seq_len, (target // align) * align)
    if cap >= seq_len:
        return seq_len
    for t in range(cap, align - 1, -align):
        if seq_len % t == 0:
            return t
    return cap  # aligned, ragged tail handled by cdiv (masked only on last tile)


def _choose_batch_tile(batch: int, cap: int) -> int:
    """Leading (non-layout) batch tile: largest value <= cap, preferring an
    exact divisor of batch so there is no ragged last block."""
    cap = max(1, min(batch, cap))
    for t in range(cap, 0, -1):
        if batch % t == 0:
            return t
    return cap


def positional_embeddings_forward(x: jnp.ndarray, emb_table: jnp.ndarray) -> jnp.ndarray:
    """x: (batch, seq_len) — only its shape matters (as in the PyTorch forward)."""
    batch, seq_len = x.shape
    num_emb, d_model = emb_table.shape
    assert seq_len <= num_emb, "seq_len must not exceed num_emb"

    # Only the first seq_len rows of the table are ever read.
    emb = jax.lax.slice(emb_table, (0, 0), (seq_len, d_model))

    row_bytes = d_model * 4  # f32

    # Seq tile: ~2 MiB input block, 8-sublane aligned.
    st = _choose_seq_tile(seq_len, row_bytes, 2 * 1024 * 1024)
    # Batch tile: ~4 MiB output block.
    out_budget = 4 * 1024 * 1024
    bt = _choose_batch_tile(batch, out_budget // max(st * row_bytes, 1))

    ns = pl.cdiv(seq_len, st)
    nb = pl.cdiv(batch, bt)
    # Guarantee >= 2 grid tiles when possible so both v7x TensorCores get work.
    if ns * nb < 2 and batch >= 2:
        bt = pl.cdiv(batch, 2)
        nb = pl.cdiv(batch, bt)

    grid = (ns, nb)  # seq tiles outer (input block constant over inner axis)

    # Explicit, generation-safe VMEM budget (double-buffered in + out blocks).
    block_bytes = 2 * (bt * st * row_bytes) + 2 * (st * row_bytes)
    vmem_limit = min(48 * 1024 * 1024, max(2 * block_bytes, 16 * 1024 * 1024))

    out = pl.pallas_call(
        _pe_broadcast_kernel,
        out_shape=jax.ShapeDtypeStruct((batch, seq_len, d_model), jnp.float32),
        grid=grid,
        in_specs=[
            pl.BlockSpec((st, d_model), lambda j, i: (j, 0)),
        ],
        out_specs=pl.BlockSpec((bt, st, d_model), lambda j, i: (i, j, 0)),
        compiler_params=pltpu.CompilerParams(
            dimension_semantics=("parallel", "parallel"),
            vmem_limit_bytes=vmem_limit,
        ),
        cost_estimate=pl.CostEstimate(
            flops=0,
            transcendentals=0,
            bytes_accessed=batch * seq_len * d_model * 4 + seq_len * d_model * 4,
        ),
    )(emb)

    return out


if __name__ == "__main__":
    # Small shapes consistent with the module's forward.
    batch, seq_len = 2, 8
    num_emb, d_model = 16, 32  # num_emb even (as the PyTorch init assumes), >= seq_len

    key = jax.random.PRNGKey(0)
    # forward() only uses the shape of `input`; values are irrelevant.
    x = jax.random.normal(key, (batch, seq_len), dtype=jnp.float32)

    emb_table = build_emb_table(num_emb, d_model)

    out = positional_embeddings_forward(x, emb_table)
    out = jax.block_until_ready(out)

    # Reference check: out[b, s, :] == emb_table[s, :]
    ref = jnp.broadcast_to(emb_table[:seq_len][None, :, :], (batch, seq_len, d_model))
    assert out.shape == (batch, seq_len, d_model)
    assert out.dtype == jnp.float32
    np.testing.assert_allclose(np.asarray(out), np.asarray(ref), rtol=0, atol=0)

    print("KERNEL_OK")
</pallas_src>

<mosaic_0001>
module attributes {stable_mosaic.version = 11 : i64} {
  func.func @_pe_broadcast_kernel(%arg0: i32, %arg1: i32, %arg2: memref<8x32xf32, #tpu.memory_space<vmem>>, %arg3: memref<1x8x32xf32, #tpu.memory_space<vmem>>) attributes {dimension_semantics = [#tpu.dimension_semantics<parallel>, #tpu.dimension_semantics<parallel>], iteration_bounds = array<i64: 1, 2>, scalar_prefetch = 0 : i64, scratch_operands = 0 : i64, tpu.core_type = #tpu.core_type<tc>, window_params = [{transform_indices = @transform_0, window_bounds = array<i64: 8, 32>}, {transform_indices = @transform_1, window_bounds = array<i64: 1, 8, 32>}]} {
    %c0 = arith.constant 0 : index
    %c0_0 = arith.constant 0 : index
    %0 = vector.load %arg2[%c0, %c0_0] : memref<8x32xf32, #tpu.memory_space<vmem>>, vector<8x32xf32>
    %1 = vector.shape_cast %0 : vector<8x32xf32> to vector<1x8x32xf32>
    %c0_1 = arith.constant 0 : index
    %c0_2 = arith.constant 0 : index
    %c0_3 = arith.constant 0 : index
    %2 = vector.load %arg3[%c0_1, %c0_2, %c0_3] : memref<1x8x32xf32, #tpu.memory_space<vmem>>, vector<1x8x32xf32>
    tpu.vector_store %arg3[%c0_1, %c0_2, %c0_3], %1 {strides = array<i32>} : memref<1x8x32xf32, #tpu.memory_space<vmem>>, vector<1x8x32xf32>,
    return
  }
  func.func @transform_0(%arg0: i32, %arg1: i32) -> (i32, i32) {
    %c0_i32 = arith.constant 0 : i32
    %c0_i32_0 = arith.constant 0 : i32
    return %arg0, %c0_i32 : i32, i32
  }
  func.func @transform_1(%arg0: i32, %arg1: i32) -> (i32, i32, i32) {
    %c0_i32 = arith.constant 0 : i32
    %c0_i32_0 = arith.constant 0 : i32
    return %arg1, %arg0, %c0_i32 : i32, i32, i32
  }
}

</mosaic_0001>

<bundles_post_ra>
// kernel: tpu_custom_call.1
= control target key start
LH: loop header
LB: loop body
LE: loop exit
PB: predicated region body
PF: predicated region fallthrough
CT: control target
= control target key end

     0   :  { %6 = vsyncpa [#allocation3], 0  ;;  %s518_s0 = inlined_call_operand.hbm [shape: f32[8,32], index: 0, kind: input, shape index: {}]   ;;  %s519_s1 = inlined_call_operand.hbm [shape: f32[2,8,32], index: 1, kind: output, shape index: {}]  }
   0x1   :  { %7 = vsyncpa [#allocation4], 0 }
   0x2   :  { %9 = vsyncpa [#allocation4 + $0x1], 0  ;;  %s423_s6 = smov 0   ;;  %s425_s7 = smov 0  }
   0x3   :  { %s427_s8 = smov 0   ;;  %s429_s9 = smov 0  }
   0x4   :  { %s431_s10 = smov 0   ;;  %s433_s11 = smov 0  }
   0x5 LB: > { %s221_s12 = sadd.s32 4294967295, %s410_s11   ;;  %s222_s13 = sadd.s32 4294967294, %s410_s11   ;;  %s410_s11 = sphi %s433_s11, %s15_s11   ;;  %s406_s10 = sphi %s431_s10, %s526_s10   ;;  %s402_s9 = sphi %s429_s9, %s525_s9   ;;  %s398_s8 = sphi %s427_s8, %s524_s8   ;;  %s394_s7 = sphi %s425_s7, %s523_s7   ;;  %s390_s6 = sphi %s423_s6, %s522_s6  }
   0x6   : > { %s24_s14 = sadd.s32 1, %s406_s10  ;;  %s62_s15 = sadd.s32 1, %s398_s8 }
   0x7   : > { %p25_p0 = scmp.ge.s32.totalorder %s24_s14, 2  ;;  %p72_p1 = scmp.ne.s32.totalorder %s398_s8, %s394_s7 }
   0x8   : > { %p73_p2 = scmp.eq.s32.totalorder %s221_s12, 1  ;;  %p78_p3 = scmp.ne.s32.totalorder %s394_s7, %s390_s6 }
   0x9   : > { %s528_s14 = smov (%p25_p0, %s24_s14), 0  ;;  %p79_p5 = scmp.eq.s32.totalorder %s222_s13, 1 }
   0xa   : > { %p463_p4 = por %p73_p2, %p72_p1  ;;  %s57_s17 = ssub.s32 %s406_s10, %s528_s14 }
   0xb   : > { %p223_p6 = scmp.ge.s32.totalorder %s410_s11, 1  ;;  %p60_p7 = scmp.eq.s32.totalorder %s57_s17, 0 }
   0xc   : > { %p470_p8 = por %p79_p5, %p78_p3  ;;  %p86_p9 = scmp.lt.s32.totalorder %s410_s11, 3 }
   0xd   : > { %s476_s19 = scalar_select %p60_p7, %s398_s8, %s62_s15  }
   0xe   : > { %p87_p10 = pnand %p223_p6, %p86_p9  ;;  %p246_p11 = scmp.eq.s32.totalorder %s221_s12, 0 }
   0xf   : > { %s100_s22 = sshll.u32 %s518_s0, 4  ;;  %s412_s23 = smov [#allocation2]   ;;  %s101_s22 = int_to_ptr.hbm [resolvable:$true] %s100_s22 }
  0x10   : > { %p238_p12 = pneg %p87_p10  ;;  %s102_s24 = sshll.u32 %s412_s23, 4  ;;  %s103_s24 = int_to_ptr.vmem [resolvable:$true] %s102_s24 }
  0x11   : > { %115 = sbr.rel (%p87_p10) target bundleno = 39 (0x27), region = 24 }
  0x12   : > { %p239_p13 = pnand %p246_p11, %p238_p12 }
  0x14   : > { %241 = dma.hbm_to_vmem [thread:$0]  (!%p239_p13), %s101_s22, 128, %s103_s24, [#allocation3]  }
  0x16   : > { %381 = dma.done.wait (%p246_p11), [#allocation3], 128  }
  0x17   : > { %383 = vsyncadd (%p246_p11), [#allocation3], 4294967168  ;;  %s128_s25 = sand.u32 1, %s394_s7   ;;  %s229_s26 = sshll.u32 %s402_s9, 3  ;;  %vm132_vm0 = vcmask 261120   ;;  %v131_v0 = vld [vmem:[#allocation2] sm:$0xff] }
  0x18   : > { %s227_s27 = sshll.u32 %s128_s25, 3  ;;  %s146_s30 = scalar_lea.hbm %s519_s1, %s229_s26 }
  0x19   : > { %s130_s2 = scalar_lea.vmem [#allocation5], %s227_s27  ;;  %s150_s4 = sshll.u32 %s146_s30, 4  ;;  %s151_s4 = int_to_ptr.hbm [resolvable:$true] %s150_s4 }
  0x1a   : > { %s148_s3 = sshll.u32 %s130_s2, 4  ;;  %133 = vst.msk [vmem:[%s130_s2] sm:$0xff] %vm132_vm0, %v131_v0  ;;  %s135_s5 = scalar_lea.sflag [#allocation4], %s128_s25  ;;  %s149_s3 = int_to_ptr.vmem [resolvable:$true] %s148_s3 }
  0x1b   : > { %s342_s12 = sshra.s32 %s151_s4, 4  ;;  %s348_s17 = scalar_lea.hbm %s519_s1, 16  ;;  %s343_s12 = int_to_ptr.hbm [resolvable:$true] %s342_s12 }
  0x1c   : > { %s344_s13 = scalar_lea.hbm %s343_s12, 8  ;;  %p349_p3 = scmp.lt.s32.totalorder %s343_s12, %s519_s1 }
  0x1d   : > { %p345_p0 = scmp.ne.s32.totalorder %s343_s12, %s344_s13  ;;  %p350_p5 = scmp.lt.s32.totalorder %s348_s17, %s344_s13 }
  0x1f   : > { %p346_p1 = pnand %p345_p0, %p463_p4  ;;  %p351_p6 = por %p350_p5, %p349_p3 }
  0x21   : > { %p347_p2 = pneg %p346_p1 }
  0x23   : > { %p352_p7 = pnand %p351_p6, %p347_p2 }
  0x25   : > { %355 = shalt.err (!%p352_p7)
}
  0x26   : > { %236 = dma.vmem_to_hbm [thread:$0]  (%p463_p4), %s149_s3, 128, %s151_s4, %s135_s5  }
  0x27 PF: > { %p248_p9 = scmp.ge.s32.totalorder %s410_s11, 2  ;;  %s162_s22 = sand.u32 1, %s390_s6  }
  0x28   : > { %s163_s23 = scalar_lea.sflag [#allocation4], %s162_s22 }
  0x29   : > { %p243_p10 = pnand %p248_p9, %p470_p8 }
  0x2b   : > { %p244_p11 = pneg %p243_p10 }
  0x2d   : > { %385 = dma.done.wait (%p244_p11), %s163_s23, 128  }
  0x2e   : > { %387 = vsyncadd (%p244_p11), %s163_s23, 4294967168  ;;  %s15_s11 = sadd.s32 1, %s410_s11   ;;  %s522_s6 = smov %s394_s7 }
  0x2f   : > { %p12_p12 = scmp.ge.s32.totalorder %s15_s11, 4   ;;  %s523_s7 = smov %s398_s8 }
  0x30   : > { %s524_s8 = smov %s476_s19  ;;  %s525_s9 = smov %s406_s10 }
  0x31   : > { %s526_s10 = smov %s528_s14  ;;  %14 = sbr.rel (!%p12_p12) target bundleno = 5 (0x5), region = 62 }
  0x36   :  { %169 = vsyncpa [#allocation3], 1 }
  0x37   :  { %171 = vsyncpa [#allocation3 + $0x1], 1 }
  0x38   :  { %172 = vsyncpa [#allocation4], 1 }
  0x39   :  { %174 = vsyncpa [#allocation4 + $0x1], 1 }

</bundles_post_ra>
